<compile_context>
chip_gen: v7x
topology: tpu7x:2x2x1
jax: 0.10.0
libtpu: 0.0.40
codegen_flags: <defaults>
</compile_context>

<pallas_src>
import jax
import jax.numpy as jnp
import numpy as np
from jax.experimental import pallas as pl
from jax.experimental.pallas import tpu as pltpu


def _downsample_kernel(x_ref, a0_ref, a1_ref, w1_ref, w2_ref, o_ref,
                       xact_ref, y1p_ref):
    """Fused PReLU -> conv3x3(s2) -> PReLU -> conv3x3(s1) for one batch image.

    x_ref   : (1, Hs, Ws, 4*C0)  2x2 space-to-depth of the zero-padded input
    a0_ref  : (1, 4*C0)          PReLU alpha for the input (tiled to s2d layout)
    a1_ref  : (1, C1)            PReLU alpha for the stage-1 activation
    w1_ref  : (9, C0, C1)        conv1 weights, tap-major
    w2_ref  : (9, C1, C2P)       conv2 weights, tap-major, Cout padded to C2P
    o_ref   : (1, Ho*Wo, C2P)    lane-dense output block
    xact_ref: VMEM (Hs, Ws, 4*C0)   scratch: PReLU'd input
    y1p_ref : VMEM (Ho+2, Wo+2, C1) scratch: zero-padded stage-1 activation
    """
    Hs, Ws, C4 = xact_ref.shape
    C0 = C4 // 4
    HoP, WoP, C1 = y1p_ref.shape
    Ho, Wo = HoP - 2, WoP - 2
    C2P = o_ref.shape[-1]

    # PReLU applied exactly once per input element.
    x = x_ref[0]
    xact_ref[...] = jnp.where(x >= 0.0, x, x * a0_ref[...])

    # --- stage 1: 3x3 conv, stride 2, pad 1 -------------------------------
    # Each tap is a contiguous slice of the space-to-depth layout:
    #   s2d[r, c, (2p+q)*C0 + ch] = x_padded[2r+p, 2c+q, ch]
    acc1 = jnp.zeros((Ho * Wo, C1), jnp.float32)
    for di in range(3):
        for dj in range(3):
            t = di * 3 + dj
            r0, p = di // 2, di % 2
            s0, q = dj // 2, dj % 2
            ch = (2 * p + q) * C0
            tap = xact_ref[r0:r0 + Ho, s0:s0 + Wo, ch:ch + C0]
            acc1 = acc1 + jnp.dot(tap.reshape(Ho * Wo, C0), w1_ref[t],
                                  preferred_element_type=jnp.float32)

    # PReLU + zero-pad the stage-1 activation entirely inside VMEM
    # (the intermediate never goes to HBM).
    y1 = acc1.reshape(Ho, Wo, C1)
    y1 = jnp.where(y1 >= 0.0, y1, y1 * a1_ref[...])
    y1p_ref[...] = jnp.zeros_like(y1p_ref)
    y1p_ref[1:Ho + 1, 1:Wo + 1, :] = y1

    # --- stage 2: 3x3 conv, stride 1, pad 1 -------------------------------
    acc2 = jnp.zeros((Ho * Wo, C2P), jnp.float32)
    for di in range(3):
        for dj in range(3):
            t = di * 3 + dj
            tap = y1p_ref[di:di + Ho, dj:dj + Wo, :]
            acc2 = acc2 + jnp.dot(tap.reshape(Ho * Wo, C1), w2_ref[t],
                                  preferred_element_type=jnp.float32)

    o_ref[0] = acc2          # (Ho*Wo, C2P) — unmasked, lane-dense store


def downsample_forward(x_nchw, alpha0, alpha1, w1, w2):
    """x_nchw: (N, C0, H, W) f32 -> (N, C2, H//2, W//2) f32 (PyTorch semantics)."""
    N, C0, H, W = x_nchw.shape
    C1 = w1.shape[0]
    C2 = w2.shape[0]
    assert H % 2 == 0 and W % 2 == 0, "spatial dims must be even"
    Hp, Wp = H + 2, W + 2            # pad=1 each side (PReLU(0) == 0, so safe)
    Hs, Ws = Hp // 2, Wp // 2        # space-to-depth spatial dims
    Ho, Wo = H // 2, W // 2          # stride-2 conv output
    C2P = ((C2 + 127) // 128) * 128  # lane-dense output channels

    # One XLA pass: pad + NCHW->NHWC + 2x2 space-to-depth (no im2col blowup).
    xp = jnp.pad(x_nchw, ((0, 0), (0, 0), (1, 1), (1, 1)))
    s2d = xp.reshape(N, C0, Hs, 2, Ws, 2).transpose(0, 2, 4, 3, 5, 1)
    s2d = s2d.reshape(N, Hs, Ws, 4 * C0)

    # Weights: torch OIHW -> (tap, Cin, Cout); conv2 Cout padded to C2P lanes.
    w1_mat = jnp.transpose(w1, (2, 3, 1, 0)).reshape(9, C0, C1)
    w2_mat = jnp.transpose(w2, (2, 3, 1, 0)).reshape(9, C1, C2)
    w2_mat = jnp.pad(w2_mat, ((0, 0), (0, 0), (0, C2P - C2)))

    a0 = jnp.tile(alpha0, 4).reshape(1, 4 * C0)   # matches s2d channel layout
    a1 = alpha1.reshape(1, C1)

    out = pl.pallas_call(
        _downsample_kernel,
        out_shape=jax.ShapeDtypeStruct((N, Ho * Wo, C2P), jnp.float32),
        grid=(N,),
        in_specs=[
            pl.BlockSpec((1, Hs, Ws, 4 * C0), lambda n: (n, 0, 0, 0)),
            pl.BlockSpec((1, 4 * C0), lambda n: (0, 0)),
            pl.BlockSpec((1, C1), lambda n: (0, 0)),
            pl.BlockSpec((9, C0, C1), lambda n: (0, 0, 0)),
            pl.BlockSpec((9, C1, C2P), lambda n: (0, 0, 0)),
        ],
        out_specs=pl.BlockSpec((1, Ho * Wo, C2P), lambda n: (n, 0, 0)),
        scratch_shapes=[
            pltpu.VMEM((Hs, Ws, 4 * C0), jnp.float32),      # PReLU'd input
            pltpu.VMEM((Ho + 2, Wo + 2, C1), jnp.float32),  # padded stage-1 act
        ],
        compiler_params=pltpu.CompilerParams(
            dimension_semantics=("parallel",)),
    )(s2d, a0, a1, w1_mat, w2_mat)

    y = out.reshape(N, Ho, Wo, C2P)[..., :C2]
    return jnp.transpose(y, (0, 3, 1, 2))   # back to NCHW at the boundary


class Downsample:
    """JAX/Pallas port of softsplatnet Downsample (deterministic synthetic init)."""

    def __init__(self, intChannels, key):
        c0, c1, c2 = intChannels
        k1, k2 = jax.random.split(key)
        self.alpha0 = jnp.full((c0,), 0.25, jnp.float32)   # PReLU init=0.25
        self.alpha1 = jnp.full((c1,), 0.25, jnp.float32)
        self.w1 = jax.random.normal(k1, (c1, c0, 3, 3), jnp.float32) / np.sqrt(9 * c0)
        self.w2 = jax.random.normal(k2, (c2, c1, 3, 3), jnp.float32) / np.sqrt(9 * c1)

    def __call__(self, x_nchw):
        return downsample_forward(x_nchw, self.alpha0, self.alpha1, self.w1, self.w2)


def _ref_forward(x, m):
    # Pure-JAX reference (matches PyTorch semantics).
    def prelu(v, a):
        return jnp.maximum(v, 0.0) + a[None, :, None, None] * jnp.minimum(v, 0.0)
    y = prelu(x, m.alpha0)
    y = jax.lax.conv_general_dilated(y, m.w1, (2, 2), ((1, 1), (1, 1)),
                                     dimension_numbers=('NCHW', 'OIHW', 'NCHW'))
    y = prelu(y, m.alpha1)
    y = jax.lax.conv_general_dilated(y, m.w2, (1, 1), ((1, 1), (1, 1)),
                                     dimension_numbers=('NCHW', 'OIHW', 'NCHW'))
    return y


if __name__ == "__main__":
    key = jax.random.PRNGKey(0)
    kx, kp = jax.random.split(key)
    intChannels = [4, 8, 16]
    x = jax.random.normal(kx, (2, intChannels[0], 16, 16), jnp.float32)

    model = Downsample(intChannels, kp)
    fwd = jax.jit(lambda v: model(v))
    out = jax.block_until_ready(fwd(x))

    ref = jax.block_until_ready(_ref_forward(x, model))
    assert out.shape == (2, intChannels[2], 8, 8), out.shape
    np.testing.assert_allclose(np.asarray(out), np.asarray(ref), rtol=1e-4, atol=1e-4)
    print("KERNEL_OK")
</pallas_src>

<mosaic_0001>
module attributes {stable_mosaic.version = 11 : i64} {
  func.func @_downsample_kernel(%arg0: i32, %arg1: memref<1x9x9x16xf32, #tpu.memory_space<vmem>>, %arg2: memref<1x16xf32, #tpu.memory_space<vmem>>, %arg3: memref<1x8xf32, #tpu.memory_space<vmem>>, %arg4: memref<9x4x8xf32, #tpu.memory_space<vmem>>, %arg5: memref<9x8x128xf32, #tpu.memory_space<vmem>>, %arg6: memref<1x64x128xf32, #tpu.memory_space<vmem>>, %arg7: memref<9x9x16xf32, #tpu.memory_space<vmem>>, %arg8: memref<10x10x8xf32, #tpu.memory_space<vmem>>) attributes {dimension_semantics = [#tpu.dimension_semantics<parallel>], iteration_bounds = array<i64: 2>, scalar_prefetch = 0 : i64, scratch_operands = 2 : i64, tpu.core_type = #tpu.core_type<tc>, window_params = [{transform_indices = @transform_0, window_bounds = array<i64: 1, 9, 9, 16>}, {pipeline_mode = #tpu.pipeline_mode<synchronous>, transform_indices = @transform_1, window_bounds = array<i64: 1, 16>}, {pipeline_mode = #tpu.pipeline_mode<synchronous>, transform_indices = @transform_2, window_bounds = array<i64: 1, 8>}, {pipeline_mode = #tpu.pipeline_mode<synchronous>, transform_indices = @transform_3, window_bounds = array<i64: 9, 4, 8>}, {pipeline_mode = #tpu.pipeline_mode<synchronous>, transform_indices = @transform_4, window_bounds = array<i64: 9, 8, 128>}, {transform_indices = @transform_5, window_bounds = array<i64: 1, 64, 128>}]} {
    %c0 = arith.constant 0 : index
    %c0_0 = arith.constant 0 : index
    %c0_1 = arith.constant 0 : index
    %c0_2 = arith.constant 0 : index
    %0 = vector.load %arg1[%c0, %c0_0, %c0_1, %c0_2] : memref<1x9x9x16xf32, #tpu.memory_space<vmem>>, vector<1x9x9x16xf32>
    %1 = vector.shape_cast %0 : vector<1x9x9x16xf32> to vector<9x9x16xf32>
    %cst = arith.constant 0.000000e+00 : f32
    %2 = vector.broadcast %cst : f32 to vector<9x9x16xf32>
    %3 = arith.cmpf oge, %1, %2 : vector<9x9x16xf32>
    %c0_3 = arith.constant 0 : index
    %c0_4 = arith.constant 0 : index
    %4 = vector.load %arg2[%c0_3, %c0_4] : memref<1x16xf32, #tpu.memory_space<vmem>>, vector<1x16xf32>
    %5 = vector.shape_cast %4 : vector<1x16xf32> to vector<1x1x16xf32>
    %6 = vector.broadcast %5 : vector<1x1x16xf32> to vector<9x9x16xf32>
    %7 = arith.mulf %1, %6 : vector<9x9x16xf32>
    %8 = arith.select %3, %1, %7 : vector<9x9x16xi1>, vector<9x9x16xf32>
    %c0_5 = arith.constant 0 : index
    %c0_6 = arith.constant 0 : index
    %c0_7 = arith.constant 0 : index
    %9 = vector.load %arg7[%c0_5, %c0_6, %c0_7] : memref<9x9x16xf32, #tpu.memory_space<vmem>>, vector<9x9x16xf32>
    tpu.vector_store %arg7[%c0_5, %c0_6, %c0_7], %8 {strides = array<i32>} : memref<9x9x16xf32, #tpu.memory_space<vmem>>, vector<9x9x16xf32>,
    %cst_8 = arith.constant 0.000000e+00 : f32
    %10 = vector.broadcast %cst_8 : f32 to vector<64x8xf32>
    %c0_9 = arith.constant 0 : index
    %c0_10 = arith.constant 0 : index
    %c0_11 = arith.constant 0 : index
    %11 = vector.load %arg7[%c0_9, %c0_10, %c0_11] : memref<9x9x16xf32, #tpu.memory_space<vmem>>, vector<8x8x4xf32>
    %12 = vector.shape_cast %11 : vector<8x8x4xf32> to vector<64x4xf32>
    %c0_12 = arith.constant 0 : index
    %c0_13 = arith.constant 0 : index
    %c0_14 = arith.constant 0 : index
    %13 = vector.load %arg4[%c0_12, %c0_13, %c0_14] : memref<9x4x8xf32, #tpu.memory_space<vmem>>, vector<1x4x8xf32>
    %14 = vector.shape_cast %13 : vector<1x4x8xf32> to vector<4x8xf32>
    %cst_15 = arith.constant dense<0.000000e+00> : vector<64x8xf32>
    %15 = tpu.matmul %12, %14, %cst_15 {dimension_numbers = #tpu.dot_dimension_numbers<[1], [0], [0], [1], [0, 0, 1, 1], [], []>} : vector<64x4xf32>, vector<4x8xf32>, vector<64x8xf32> -> vector<64x8xf32>
    %16 = arith.addf %10, %15 : vector<64x8xf32>
    %c0_16 = arith.constant 0 : index
    %c0_17 = arith.constant 0 : index
    %c4 = arith.constant 4 : index
    %17 = vector.load %arg7[%c0_16, %c0_17, %c4] : memref<9x9x16xf32, #tpu.memory_space<vmem>>, vector<8x8x4xf32>
    %18 = vector.shape_cast %17 : vector<8x8x4xf32> to vector<64x4xf32>
    %c1 = arith.constant 1 : index
    %c0_18 = arith.constant 0 : index
    %c0_19 = arith.constant 0 : index
    %19 = vector.load %arg4[%c1, %c0_18, %c0_19] : memref<9x4x8xf32, #tpu.memory_space<vmem>>, vector<1x4x8xf32>
    %20 = vector.shape_cast %19 : vector<1x4x8xf32> to vector<4x8xf32>
    %cst_20 = arith.constant dense<0.000000e+00> : vector<64x8xf32>
    %21 = tpu.matmul %18, %20, %cst_20 {dimension_numbers = #tpu.dot_dimension_numbers<[1], [0], [0], [1], [0, 0, 1, 1], [], []>} : vector<64x4xf32>, vector<4x8xf32>, vector<64x8xf32> -> vector<64x8xf32>
    %22 = arith.addf %16, %21 : vector<64x8xf32>
    %c0_21 = arith.constant 0 : index
    %c1_22 = arith.constant 1 : index
    %c0_23 = arith.constant 0 : index
    %23 = vector.load %arg7[%c0_21, %c1_22, %c0_23] : memref<9x9x16xf32, #tpu.memory_space<vmem>>, vector<8x8x4xf32>
    %24 = vector.shape_cast %23 : vector<8x8x4xf32> to vector<64x4xf32>
    %c2 = arith.constant 2 : index
    %c0_24 = arith.constant 0 : index
    %c0_25 = arith.constant 0 : index
    %25 = vector.load %arg4[%c2, %c0_24, %c0_25] : memref<9x4x8xf32, #tpu.memory_space<vmem>>, vector<1x4x8xf32>
    %26 = vector.shape_cast %25 : vector<1x4x8xf32> to vector<4x8xf32>
    %cst_26 = arith.constant dense<0.000000e+00> : vector<64x8xf32>
    %27 = tpu.matmul %24, %26, %cst_26 {dimension_numbers = #tpu.dot_dimension_numbers<[1], [0], [0], [1], [0, 0, 1, 1], [], []>} : vector<64x4xf32>, vector<4x8xf32>, vector<64x8xf32> -> vector<64x8xf32>
    %28 = arith.addf %22, %27 : vector<64x8xf32>
    %c0_27 = arith.constant 0 : index
    %c0_28 = arith.constant 0 : index
    %c8 = arith.constant 8 : index
    %29 = vector.load %arg7[%c0_27, %c0_28, %c8] : memref<9x9x16xf32, #tpu.memory_space<vmem>>, vector<8x8x4xf32>
    %30 = vector.shape_cast %29 : vector<8x8x4xf32> to vector<64x4xf32>
    %c3 = arith.constant 3 : index
    %c0_29 = arith.constant 0 : index
    %c0_30 = arith.constant 0 : index
    %31 = vector.load %arg4[%c3, %c0_29, %c0_30] : memref<9x4x8xf32, #tpu.memory_space<vmem>>, vector<1x4x8xf32>
    %32 = vector.shape_cast %31 : vector<1x4x8xf32> to vector<4x8xf32>
    %cst_31 = arith.constant dense<0.000000e+00> : vector<64x8xf32>
    %33 = tpu.matmul %30, %32, %cst_31 {dimension_numbers = #tpu.dot_dimension_numbers<[1], [0], [0], [1], [0, 0, 1, 1], [], []>} : vector<64x4xf32>, vector<4x8xf32>, vector<64x8xf32> -> vector<64x8xf32>
    %34 = arith.addf %28, %33 : vector<64x8xf32>
    %c0_32 = arith.constant 0 : index
    %c0_33 = arith.constant 0 : index
    %c12 = arith.constant 12 : index
    %35 = vector.load %arg7[%c0_32, %c0_33, %c12] : memref<9x9x16xf32, #tpu.memory_space<vmem>>, vector<8x8x4xf32>
    %36 = vector.shape_cast %35 : vector<8x8x4xf32> to vector<64x4xf32>
    %c4_34 = arith.constant 4 : index
    %c0_35 = arith.constant 0 : index
    %c0_36 = arith.constant 0 : index
    %37 = vector.load %arg4[%c4_34, %c0_35, %c0_36] : memref<9x4x8xf32, #tpu.memory_space<vmem>>, vector<1x4x8xf32>
    %38 = vector.shape_cast %37 : vector<1x4x8xf32> to vector<4x8xf32>
    %cst_37 = arith.constant dense<0.000000e+00> : vector<64x8xf32>
    %39 = tpu.matmul %36, %38, %cst_37 {dimension_numbers = #tpu.dot_dimension_numbers<[1], [0], [0], [1], [0, 0, 1, 1], [], []>} : vector<64x4xf32>, vector<4x8xf32>, vector<64x8xf32> -> vector<64x8xf32>
    %40 = arith.addf %34, %39 : vector<64x8xf32>
    %c0_38 = arith.constant 0 : index
    %c1_39 = arith.constant 1 : index
    %c8_40 = arith.constant 8 : index
    %41 = vector.load %arg7[%c0_38, %c1_39, %c8_40] : memref<9x9x16xf32, #tpu.memory_space<vmem>>, vector<8x8x4xf32>
    %42 = vector.shape_cast %41 : vector<8x8x4xf32> to vector<64x4xf32>
    %c5 = arith.constant 5 : index
    %c0_41 = arith.constant 0 : index
    %c0_42 = arith.constant 0 : index
    %43 = vector.load %arg4[%c5, %c0_41, %c0_42] : memref<9x4x8xf32, #tpu.memory_space<vmem>>, vector<1x4x8xf32>
    %44 = vector.shape_cast %43 : vector<1x4x8xf32> to vector<4x8xf32>
    %cst_43 = arith.constant dense<0.000000e+00> : vector<64x8xf32>
    %45 = tpu.matmul %42, %44, %cst_43 {dimension_numbers = #tpu.dot_dimension_numbers<[1], [0], [0], [1], [0, 0, 1, 1], [], []>} : vector<64x4xf32>, vector<4x8xf32>, vector<64x8xf32> -> vector<64x8xf32>
    %46 = arith.addf %40, %45 : vector<64x8xf32>
    %c1_44 = arith.constant 1 : index
    %c0_45 = arith.constant 0 : index
    %c0_46 = arith.constant 0 : index
    %47 = vector.load %arg7[%c1_44, %c0_45, %c0_46] : memref<9x9x16xf32, #tpu.memory_space<vmem>>, vector<8x8x4xf32>
    %48 = vector.shape_cast %47 : vector<8x8x4xf32> to vector<64x4xf32>
    %c6 = arith.constant 6 : index
    %c0_47 = arith.constant 0 : index
    %c0_48 = arith.constant 0 : index
    %49 = vector.load %arg4[%c6, %c0_47, %c0_48] : memref<9x4x8xf32, #tpu.memory_space<vmem>>, vector<1x4x8xf32>
    %50 = vector.shape_cast %49 : vector<1x4x8xf32> to vector<4x8xf32>
    %cst_49 = arith.constant dense<0.000000e+00> : vector<64x8xf32>
    %51 = tpu.matmul %48, %50, %cst_49 {dimension_numbers = #tpu.dot_dimension_numbers<[1], [0], [0], [1], [0, 0, 1, 1], [], []>} : vector<64x4xf32>, vector<4x8xf32>, vector<64x8xf32> -> vector<64x8xf32>
    %52 = arith.addf %46, %51 : vector<64x8xf32>
    %c1_50 = arith.constant 1 : index
    %c0_51 = arith.constant 0 : index
    %c4_52 = arith.constant 4 : index
    %53 = vector.load %arg7[%c1_50, %c0_51, %c4_52] : memref<9x9x16xf32, #tpu.memory_space<vmem>>, vector<8x8x4xf32>
    %54 = vector.shape_cast %53 : vector<8x8x4xf32> to vector<64x4xf32>
    %c7 = arith.constant 7 : index
    %c0_53 = arith.constant 0 : index
    %c0_54 = arith.constant 0 : index
    %55 = vector.load %arg4[%c7, %c0_53, %c0_54] : memref<9x4x8xf32, #tpu.memory_space<vmem>>, vector<1x4x8xf32>
    %56 = vector.shape_cast %55 : vector<1x4x8xf32> to vector<4x8xf32>
    %cst_55 = arith.constant dense<0.000000e+00> : vector<64x8xf32>
    %57 = tpu.matmul %54, %56, %cst_55 {dimension_numbers = #tpu.dot_dimension_numbers<[1], [0], [0], [1], [0, 0, 1, 1], [], []>} : vector<64x4xf32>, vector<4x8xf32>, vector<64x8xf32> -> vector<64x8xf32>
    %58 = arith.addf %52, %57 : vector<64x8xf32>
    %c1_56 = arith.constant 1 : index
    %c1_57 = arith.constant 1 : index
    %c0_58 = arith.constant 0 : index
    %59 = vector.load %arg7[%c1_56, %c1_57, %c0_58] : memref<9x9x16xf32, #tpu.memory_space<vmem>>, vector<8x8x4xf32>
    %60 = vector.shape_cast %59 : vector<8x8x4xf32> to vector<64x4xf32>
    %c8_59 = arith.constant 8 : index
    %c0_60 = arith.constant 0 : index
    %c0_61 = arith.constant 0 : index
    %61 = vector.load %arg4[%c8_59, %c0_60, %c0_61] : memref<9x4x8xf32, #tpu.memory_space<vmem>>, vector<1x4x8xf32>
    %62 = vector.shape_cast %61 : vector<1x4x8xf32> to vector<4x8xf32>
    %cst_62 = arith.constant dense<0.000000e+00> : vector<64x8xf32>
    %63 = tpu.matmul %60, %62, %cst_62 {dimension_numbers = #tpu.dot_dimension_numbers<[1], [0], [0], [1], [0, 0, 1, 1], [], []>} : vector<64x4xf32>, vector<4x8xf32>, vector<64x8xf32> -> vector<64x8xf32>
    %64 = arith.addf %58, %63 : vector<64x8xf32>
    %65 = vector.shape_cast %64 : vector<64x8xf32> to vector<8x8x8xf32>
    %cst_63 = arith.constant 0.000000e+00 : f32
    %66 = vector.broadcast %cst_63 : f32 to vector<8x8x8xf32>
    %67 = arith.cmpf oge, %65, %66 : vector<8x8x8xf32>
    %c0_64 = arith.constant 0 : index
    %c0_65 = arith.constant 0 : index
    %68 = vector.load %arg3[%c0_64, %c0_65] : memref<1x8xf32, #tpu.memory_space<vmem>>, vector<1x8xf32>
    %69 = vector.shape_cast %68 : vector<1x8xf32> to vector<1x1x8xf32>
    %70 = vector.broadcast %69 : vector<1x1x8xf32> to vector<8x8x8xf32>
    %71 = arith.mulf %65, %70 : vector<8x8x8xf32>
    %72 = arith.select %67, %65, %71 : vector<8x8x8xi1>, vector<8x8x8xf32>
    %cst_66 = arith.constant 0.000000e+00 : f32
    %73 = vector.broadcast %cst_66 : f32 to vector<10x10x8xf32>
    %c0_67 = arith.constant 0 : index
    %c0_68 = arith.constant 0 : index
    %c0_69 = arith.constant 0 : index
    %74 = vector.load %arg8[%c0_67, %c0_68, %c0_69] : memref<10x10x8xf32, #tpu.memory_space<vmem>>, vector<10x10x8xf32>
    tpu.vector_store %arg8[%c0_67, %c0_68, %c0_69], %73 {strides = array<i32>} : memref<10x10x8xf32, #tpu.memory_space<vmem>>, vector<10x10x8xf32>,
    %c1_70 = arith.constant 1 : index
    %c1_71 = arith.constant 1 : index
    %c0_72 = arith.constant 0 : index
    %75 = vector.load %arg8[%c1_70, %c1_71, %c0_72] : memref<10x10x8xf32, #tpu.memory_space<vmem>>, vector<8x8x8xf32>
    tpu.vector_store %arg8[%c1_70, %c1_71, %c0_72], %72 {strides = array<i32>} : memref<10x10x8xf32, #tpu.memory_space<vmem>>, vector<8x8x8xf32>,
    %cst_73 = arith.constant 0.000000e+00 : f32
    %76 = vector.broadcast %cst_73 : f32 to vector<64x128xf32>
    %c0_74 = arith.constant 0 : index
    %c0_75 = arith.constant 0 : index
    %c0_76 = arith.constant 0 : index
    %77 = vector.load %arg8[%c0_74, %c0_75, %c0_76] : memref<10x10x8xf32, #tpu.memory_space<vmem>>, vector<8x8x8xf32>
    %78 = vector.shape_cast %77 : vector<8x8x8xf32> to vector<64x8xf32>
    %c0_77 = arith.constant 0 : index
    %c0_78 = arith.constant 0 : index
    %c0_79 = arith.constant 0 : index
    %79 = vector.load %arg5[%c0_77, %c0_78, %c0_79] : memref<9x8x128xf32, #tpu.memory_space<vmem>>, vector<1x8x128xf32>
    %80 = vector.shape_cast %79 : vector<1x8x128xf32> to vector<8x128xf32>
    %cst_80 = arith.constant dense<0.000000e+00> : vector<64x128xf32>
    %81 = tpu.matmul %78, %80, %cst_80 {dimension_numbers = #tpu.dot_dimension_numbers<[1], [0], [0], [1], [0, 0, 1, 1], [], []>} : vector<64x8xf32>, vector<8x128xf32>, vector<64x128xf32> -> vector<64x128xf32>
    %82 = arith.addf %76, %81 : vector<64x128xf32>
    %c0_81 = arith.constant 0 : index
    %c1_82 = arith.constant 1 : index
    %c0_83 = arith.constant 0 : index
    %83 = vector.load %arg8[%c0_81, %c1_82, %c0_83] : memref<10x10x8xf32, #tpu.memory_space<vmem>>, vector<8x8x8xf32>
    %84 = vector.shape_cast %83 : vector<8x8x8xf32> to vector<64x8xf32>
    %c1_84 = arith.constant 1 : index
    %c0_85 = arith.constant 0 : index
    %c0_86 = arith.constant 0 : index
    %85 = vector.load %arg5[%c1_84, %c0_85, %c0_86] : memref<9x8x128xf32, #tpu.memory_space<vmem>>, vector<1x8x128xf32>
    %86 = vector.shape_cast %85 : vector<1x8x128xf32> to vector<8x128xf32>
    %cst_87 = arith.constant dense<0.000000e+00> : vector<64x128xf32>
    %87 = tpu.matmul %84, %86, %cst_87 {dimension_numbers = #tpu.dot_dimension_numbers<[1], [0], [0], [1], [0, 0, 1, 1], [], []>} : vector<64x8xf32>, vector<8x128xf32>, vector<64x128xf32> -> vector<64x128xf32>
    %88 = arith.addf %82, %87 : vector<64x128xf32>
    %c0_88 = arith.constant 0 : index
    %c2_89 = arith.constant 2 : index
    %c0_90 = arith.constant 0 : index
    %89 = vector.load %arg8[%c0_88, %c2_89, %c0_90] : memref<10x10x8xf32, #tpu.memory_space<vmem>>, vector<8x8x8xf32>
    %90 = vector.shape_cast %89 : vector<8x8x8xf32> to vector<64x8xf32>
    %c2_91 = arith.constant 2 : index
    %c0_92 = arith.constant 0 : index
    %c0_93 = arith.constant 0 : index
    %91 = vector.load %arg5[%c2_91, %c0_92, %c0_93] : memref<9x8x128xf32, #tpu.memory_space<vmem>>, vector<1x8x128xf32>
    %92 = vector.shape_cast %91 : vector<1x8x128xf32> to vector<8x128xf32>
    %cst_94 = arith.constant dense<0.000000e+00> : vector<64x128xf32>
    %93 = tpu.matmul %90, %92, %cst_94 {dimension_numbers = #tpu.dot_dimension_numbers<[1], [0], [0], [1], [0, 0, 1, 1], [], []>} : vector<64x8xf32>, vector<8x128xf32>, vector<64x128xf32> -> vector<64x128xf32>
    %94 = arith.addf %88, %93 : vector<64x128xf32>
    %c1_95 = arith.constant 1 : index
    %c0_96 = arith.constant 0 : index
    %c0_97 = arith.constant 0 : index
    %95 = vector.load %arg8[%c1_95, %c0_96, %c0_97] : memref<10x10x8xf32, #tpu.memory_space<vmem>>, vector<8x8x8xf32>
    %96 = vector.shape_cast %95 : vector<8x8x8xf32> to vector<64x8xf32>
    %c3_98 = arith.constant 3 : index
    %c0_99 = arith.constant 0 : index
    %c0_100 = arith.constant 0 : index
    %97 = vector.load %arg5[%c3_98, %c0_99, %c0_100] : memref<9x8x128xf32, #tpu.memory_space<vmem>>, vector<1x8x128xf32>
    %98 = vector.shape_cast %97 : vector<1x8x128xf32> to vector<8x128xf32>
    %cst_101 = arith.constant dense<0.000000e+00> : vector<64x128xf32>
    %99 = tpu.matmul %96, %98, %cst_101 {dimension_numbers = #tpu.dot_dimension_numbers<[1], [0], [0], [1], [0, 0, 1, 1], [], []>} : vector<64x8xf32>, vector<8x128xf32>, vector<64x128xf32> -> vector<64x128xf32>
    %100 = arith.addf %94, %99 : vector<64x128xf32>
    %c1_102 = arith.constant 1 : index
    %c1_103 = arith.constant 1 : index
    %c0_104 = arith.constant 0 : index
    %101 = vector.load %arg8[%c1_102, %c1_103, %c0_104] : memref<10x10x8xf32, #tpu.memory_space<vmem>>, vector<8x8x8xf32>
    %102 = vector.shape_cast %101 : vector<8x8x8xf32> to vector<64x8xf32>
    %c4_105 = arith.constant 4 : index
    %c0_106 = arith.constant 0 : index
    %c0_107 = arith.constant 0 : index
    %103 = vector.load %arg5[%c4_105, %c0_106, %c0_107] : memref<9x8x128xf32, #tpu.memory_space<vmem>>, vector<1x8x128xf32>
    %104 = vector.shape_cast %103 : vector<1x8x128xf32> to vector<8x128xf32>
    %cst_108 = arith.constant dense<0.000000e+00> : vector<64x128xf32>
    %105 = tpu.matmul %102, %104, %cst_108 {dimension_numbers = #tpu.dot_dimension_numbers<[1], [0], [0], [1], [0, 0, 1, 1], [], []>} : vector<64x8xf32>, vector<8x128xf32>, vector<64x128xf32> -> vector<64x128xf32>
    %106 = arith.addf %100, %105 : vector<64x128xf32>
    %c1_109 = arith.constant 1 : index
    %c2_110 = arith.constant 2 : index
    %c0_111 = arith.constant 0 : index
    %107 = vector.load %arg8[%c1_109, %c2_110, %c0_111] : memref<10x10x8xf32, #tpu.memory_space<vmem>>, vector<8x8x8xf32>
    %108 = vector.shape_cast %107 : vector<8x8x8xf32> to vector<64x8xf32>
    %c5_112 = arith.constant 5 : index
    %c0_113 = arith.constant 0 : index
    %c0_114 = arith.constant 0 : index
    %109 = vector.load %arg5[%c5_112, %c0_113, %c0_114] : memref<9x8x128xf32, #tpu.memory_space<vmem>>, vector<1x8x128xf32>
    %110 = vector.shape_cast %109 : vector<1x8x128xf32> to vector<8x128xf32>
    %cst_115 = arith.constant dense<0.000000e+00> : vector<64x128xf32>
    %111 = tpu.matmul %108, %110, %cst_115 {dimension_numbers = #tpu.dot_dimension_numbers<[1], [0], [0], [1], [0, 0, 1, 1], [], []>} : vector<64x8xf32>, vector<8x128xf32>, vector<64x128xf32> -> vector<64x128xf32>
    %112 = arith.addf %106, %111 : vector<64x128xf32>
    %c2_116 = arith.constant 2 : index
    %c0_117 = arith.constant 0 : index
    %c0_118 = arith.constant 0 : index
    %113 = vector.load %arg8[%c2_116, %c0_117, %c0_118] : memref<10x10x8xf32, #tpu.memory_space<vmem>>, vector<8x8x8xf32>
    %114 = vector.shape_cast %113 : vector<8x8x8xf32> to vector<64x8xf32>
    %c6_119 = arith.constant 6 : index
    %c0_120 = arith.constant 0 : index
    %c0_121 = arith.constant 0 : index
    %115 = vector.load %arg5[%c6_119, %c0_120, %c0_121] : memref<9x8x128xf32, #tpu.memory_space<vmem>>, vector<1x8x128xf32>
    %116 = vector.shape_cast %115 : vector<1x8x128xf32> to vector<8x128xf32>
    %cst_122 = arith.constant dense<0.000000e+00> : vector<64x128xf32>
    %117 = tpu.matmul %114, %116, %cst_122 {dimension_numbers = #tpu.dot_dimension_numbers<[1], [0], [0], [1], [0, 0, 1, 1], [], []>} : vector<64x8xf32>, vector<8x128xf32>, vector<64x128xf32> -> vector<64x128xf32>
    %118 = arith.addf %112, %117 : vector<64x128xf32>
    %c2_123 = arith.constant 2 : index
    %c1_124 = arith.constant 1 : index
    %c0_125 = arith.constant 0 : index
    %119 = vector.load %arg8[%c2_123, %c1_124, %c0_125] : memref<10x10x8xf32, #tpu.memory_space<vmem>>, vector<8x8x8xf32>
    %120 = vector.shape_cast %119 : vector<8x8x8xf32> to vector<64x8xf32>
    %c7_126 = arith.constant 7 : index
    %c0_127 = arith.constant 0 : index
    %c0_128 = arith.constant 0 : index
    %121 = vector.load %arg5[%c7_126, %c0_127, %c0_128] : memref<9x8x128xf32, #tpu.memory_space<vmem>>, vector<1x8x128xf32>
    %122 = vector.shape_cast %121 : vector<1x8x128xf32> to vector<8x128xf32>
    %cst_129 = arith.constant dense<0.000000e+00> : vector<64x128xf32>
    %123 = tpu.matmul %120, %122, %cst_129 {dimension_numbers = #tpu.dot_dimension_numbers<[1], [0], [0], [1], [0, 0, 1, 1], [], []>} : vector<64x8xf32>, vector<8x128xf32>, vector<64x128xf32> -> vector<64x128xf32>
    %124 = arith.addf %118, %123 : vector<64x128xf32>
    %c2_130 = arith.constant 2 : index
    %c2_131 = arith.constant 2 : index
    %c0_132 = arith.constant 0 : index
    %125 = vector.load %arg8[%c2_130, %c2_131, %c0_132] : memref<10x10x8xf32, #tpu.memory_space<vmem>>, vector<8x8x8xf32>
    %126 = vector.shape_cast %125 : vector<8x8x8xf32> to vector<64x8xf32>
    %c8_133 = arith.constant 8 : index
    %c0_134 = arith.constant 0 : index
    %c0_135 = arith.constant 0 : index
    %127 = vector.load %arg5[%c8_133, %c0_134, %c0_135] : memref<9x8x128xf32, #tpu.memory_space<vmem>>, vector<1x8x128xf32>
    %128 = vector.shape_cast %127 : vector<1x8x128xf32> to vector<8x128xf32>
    %cst_136 = arith.constant dense<0.000000e+00> : vector<64x128xf32>
    %129 = tpu.matmul %126, %128, %cst_136 {dimension_numbers = #tpu.dot_dimension_numbers<[1], [0], [0], [1], [0, 0, 1, 1], [], []>} : vector<64x8xf32>, vector<8x128xf32>, vector<64x128xf32> -> vector<64x128xf32>
    %130 = arith.addf %124, %129 : vector<64x128xf32>
    %c0_137 = arith.constant 0 : index
    %c0_138 = arith.constant 0 : index
    %c0_139 = arith.constant 0 : index
    %131 = vector.load %arg6[%c0_137, %c0_138, %c0_139] : memref<1x64x128xf32, #tpu.memory_space<vmem>>, vector<1x64x128xf32>
    %132 = vector.shape_cast %131 : vector<1x64x128xf32> to vector<64x128xf32>
    %133 = vector.shape_cast %130 : vector<64x128xf32> to vector<1x64x128xf32>
    tpu.vector_store %arg6[%c0_137, %c0_138, %c0_139], %133 {strides = array<i32>} : memref<1x64x128xf32, #tpu.memory_space<vmem>>, vector<1x64x128xf32>,
    return
  }
  func.func @transform_0(%arg0: i32) -> (i32, i32, i32, i32) {
    %c0_i32 = arith.constant 0 : i32
    %c0_i32_0 = arith.constant 0 : i32
    %c0_i32_1 = arith.constant 0 : i32
    %c0_i32_2 = arith.constant 0 : i32
    return %arg0, %c0_i32, %c0_i32_0, %c0_i32_1 : i32, i32, i32, i32
  }
  func.func @transform_1(%arg0: i32) -> (i32, i32) {
    %c0_i32 = arith.constant 0 : i32
    %c0_i32_0 = arith.constant 0 : i32
    %c0_i32_1 = arith.constant 0 : i32
    return %c0_i32, %c0_i32_0 : i32, i32
  }
  func.func @transform_2(%arg0: i32) -> (i32, i32) {
    %c0_i32 = arith.constant 0 : i32
    %c0_i32_0 = arith.constant 0 : i32
    %c0_i32_1 = arith.constant 0 : i32
    return %c0_i32, %c0_i32_0 : i32, i32
  }
  func.func @transform_3(%arg0: i32) -> (i32, i32, i32) {
    %c0_i32 = arith.constant 0 : i32
    %c0_i32_0 = arith.constant 0 : i32
    %c0_i32_1 = arith.constant 0 : i32
    %c0_i32_2 = arith.constant 0 : i32
    return %c0_i32, %c0_i32_0, %c0_i32_1 : i32, i32, i32
  }
  func.func @transform_4(%arg0: i32) -> (i32, i32, i32) {
    %c0_i32 = arith.constant 0 : i32
    %c0_i32_0 = arith.constant 0 : i32
    %c0_i32_1 = arith.constant 0 : i32
    %c0_i32_2 = arith.constant 0 : i32
    return %c0_i32, %c0_i32_0, %c0_i32_1 : i32, i32, i32
  }
  func.func @transform_5(%arg0: i32) -> (i32, i32, i32) {
    %c0_i32 = arith.constant 0 : i32
    %c0_i32_0 = arith.constant 0 : i32
    %c0_i32_1 = arith.constant 0 : i32
    return %arg0, %c0_i32, %c0_i32_0 : i32, i32, i32
  }
}

</mosaic_0001>

<bundles_post_ra>
// kernel: _lambda_.1
= control target key start
LH: loop header
LB: loop body
LE: loop exit
PB: predicated region body
PF: predicated region fallthrough
CT: control target
= control target key end

     0   :  { %s3871_s18 = smov 0   ;;  %s4439_s0 = inlined_call_operand.vmem [shape: f32[2,9,9,16], index: 0, kind: input, shape index: {}]   ;;  %s4440_s1 = inlined_call_operand.vmem [shape: f32[1,16], index: 1, kind: input, shape index: {}]   ;;  %s4441_s2 = inlined_call_operand.vmem [shape: f32[1,8], index: 2, kind: input, shape index: {}]   ;;  %s4442_s3 = inlined_call_operand.vmem [shape: f32[9,4,8], index: 3, kind: input, shape index: {}]   ;;  %s4443_s4 = inlined_call_operand.vmem [shape: f32[9,8,128], index: 4, kind: input, shape index: {}]   ;;  %s4444_s5 = inlined_call_operand.vmem [shape: f32[2,64,128], index: 5, kind: output, shape index: {}]  }
   0x1 LB: > { %s3092_s19 = sadd.s32 4294967295, %s3835_s18   ;;  %p3096_p0 = scmp.ge.s32.totalorder %s3835_s18, 1  ;;  %s3835_s18 = sphi %s3871_s18, %s15_s18  }
   0x2   : > { %p187_p1 = scmp.lt.s32.totalorder %s3835_s18, 3 }
   0x4   : > { %p188_p2 = pnand %p3096_p0, %p187_p1 }
   0x5   : > { %p215_p3 = scmp.lt.s32.totalorder (!%p188_p2), %s3092_s19, 1  ;;  %v3885_v0 = vld [vmem:[%s4440_s1] ss:$0 sm:$0xff] (!%p188_p2)  ;;  %v3101_v1 = vld [vmem:[%s4442_s3 + $0x4] sm:$0xf] (!%p188_p2)  ;;  %vm376_vm0 = vcmask (!%p188_p2), 1043456  }
   0x6   : > { %191 = sbr.rel (%p188_p2) target bundleno = 854 (0x356), region = 40  ;;  %v3898_v2 = vld [vmem:[%s4442_s3] sm:$0xf] (!%p188_p2)  ;;  %vm304_vm1 = vcmask (!%p188_p2), 130048   ;;  %vm306_vm2 = vcmask (!%p188_p2), 122880   ;;  %3436 = vmatprep.subr.msk.mxu0 (!%p188_p2), %vm376_vm0, %v3101_v1  ;;  %s3837_s30 = smov (!%p188_p2), 124  }
   0x7   : > { %3437 = vmatpush3.msk.msra.mxu0 (!%p188_p2), %vm376_vm0, %v3101_v1  ;;  %s3838_s6 = smov (!%p188_p2), 120   ;;  %s3839_s7 = smov (!%p188_p2), 116  }
   0x8   : > { %3450 = vmatprep.subr.msk.mxu0 (!%p188_p2), %vm376_vm0, %v3898_v2 }
   0xd   : > { %s4446_s19 = smov (!%p215_p3, %s3092_s19), 1 }
   0xe   : > { %s3816_s20 = smul.u32 144, %s4446_s19  ;;  %s3273_s21 = sshll.u32 %s4446_s19, 6 }
   0xf   : > { %s224_s24 = scalar_lea.vmem %s4444_s5, %s3273_s21 }
  0x10   : > { %s3890_s25 = scalar_lea.vmem %s4439_s0, %s3816_s20 }
  0x11   : > { %v225_v3 = vld [vmem:[%s3890_s25] sm:$0xff]  ;;  %v227_v5 = vld [vmem:[%s3890_s25 + $0x10] sm:$0xff]  ;;  %v226_v18 = vld [vmem:[%s3890_s25 + $0x8] sm:$0x1] }
  0x12   : > { %v229_v4 = vld [vmem:[%s3890_s25 + $0x20] sm:$0xff]  ;;  %vm243_vm3 = vcmp.ge.f32.partialorder %v225_v3, 0.0  ;;  %v268_v6 = vmul.f32 %v3885_v0, %v225_v3  ;;  %v231_v8 = vld [vmem:[%s3890_s25 + $0x30] sm:$0xff]  ;;  %vm245_vm5 = vcmp.ge.f32.partialorder %v227_v5, 0.0  ;;  %v270_v11 = vmul.f32 %v3885_v0, %v227_v5  ;;  %v228_v22 = vld [vmem:[%s3890_s25 + $0x18] sm:$0x1] }
  0x13   : > { %vm247_vm4 = vcmp.ge.f32.partialorder %v229_v4, 0.0  ;;  %v272_v7 = vmul.f32 %v3885_v0, %v229_v4  ;;  %v233_v9 = vld [vmem:[%s3890_s25 + $0x40] sm:$0xff]  ;;  %v235_v10 = vld [vmem:[%s3890_s25 + $0x50] sm:$0xff]  ;;  %vm249_vm6 = vcmp.ge.f32.partialorder %v231_v8, 0.0  ;;  %v274_v12 = vmul.f32 %v3885_v0, %v231_v8  ;;  %v230_v23 = vld [vmem:[%s3890_s25 + $0x28] sm:$0x1] }
  0x14   : > { %v237_v13 = vld [vmem:[%s3890_s25 + $0x60] sm:$0xff]  ;;  %v239_v14 = vld [vmem:[%s3890_s25 + $0x70] sm:$0xff]  ;;  %v286_v15 = vsel %vm243_vm3, %v225_v3, %v268_v6  ;;  %vm251_vm7 = vcmp.ge.f32.partialorder %v233_v9, 0.0  ;;  %v276_v17 = vmul.f32 %v3885_v0, %v233_v9  ;;  %v288_v19 = vsel %vm245_vm5, %v227_v5, %v270_v11  ;;  %v232_v26 = vld [vmem:[%s3890_s25 + $0x38] sm:$0x1] }
  0x15   : > { %v290_v16 = vsel %vm247_vm4, %v229_v4, %v272_v7  ;;  %305 = vst.msk [vmem:[#allocation2] sm:$0xff] %vm304_vm1, %v286_v15  ;;  %v292_v20 = vsel %vm249_vm6, %v231_v8, %v274_v12  ;;  %vm253_vm8 = vcmp.ge.f32.partialorder %v235_v10, 0.0  ;;  %v278_v21 = vmul.f32 %v3885_v0, %v235_v10  ;;  %308 = vst.msk [vmem:[#allocation2 + $0x10] sm:$0xff] %vm304_vm1, %v288_v19  ;;  %v234_v30 = vld [vmem:[%s3890_s25 + $0x48] sm:$0x1]  ;;  %v241_v42 = vld [vmem:[%s3890_s25 + $0x80] sm:$0xff] }
  0x16   : > { %310 = vst.msk [vmem:[#allocation2 + $0x20] sm:$0xff] %vm304_vm1, %v290_v16  ;;  %312 = vst.msk [vmem:[#allocation2 + $0x30] sm:$0xff] %vm304_vm1, %v292_v20  ;;  %v294_v24 = vsel %vm251_vm7, %v233_v9, %v276_v17  ;;  %vm255_vm9 = vcmp.ge.f32.partialorder %v237_v13, 0.0  ;;  %v280_v25 = vmul.f32 %v3885_v0, %v237_v13  ;;  %vm257_vm10 = vcmp.ge.f32.partialorder %v239_v14, 0.0  ;;  %v236_v33 = vld [vmem:[%s3890_s25 + $0x58] sm:$0x1] }
  0x17   : > { %314 = vst.msk [vmem:[#allocation2 + $0x40] sm:$0xff] %vm304_vm1, %v294_v24  ;;  %v296_v27 = vsel %vm253_vm8, %v235_v10, %v278_v21  ;;  %v282_v28 = vmul.f32 %v3885_v0, %v239_v14  ;;  %vm244_vm11 = vcmp.ge.f32.partialorder %v226_v18, 0.0  ;;  %v269_v29 = vmul.f32 %v3885_v0, %v226_v18  ;;  %v238_v34 = vld [vmem:[%s3890_s25 + $0x68] sm:$0x1]  ;;  %v240_v38 = vld [vmem:[%s3890_s25 + $0x78] sm:$0x1] }
  0x18   : > { %316 = vst.msk [vmem:[#allocation2 + $0x50] sm:$0xff] %vm304_vm1, %v296_v27  ;;  %v298_v31 = vsel %vm255_vm9, %v237_v13, %v280_v25  ;;  %vm246_vm12 = vcmp.ge.f32.partialorder %v228_v22, 0.0  ;;  %v271_v32 = vmul.f32 %v3885_v0, %v228_v22  ;;  %vm248_vm13 = vcmp.ge.f32.partialorder %v230_v23, 0.0  ;;  %v3120_v13 = vld [vmem:[%s4442_s3 + $0x8] sm:$0xf] }
  0x19   : > { %318 = vst.msk [vmem:[#allocation2 + $0x60] sm:$0xff] %vm304_vm1, %v298_v31  ;;  %v300_v35 = vsel %vm257_vm10, %v239_v14, %v282_v28  ;;  %v287_v36 = vsel %vm244_vm11, %v226_v18, %v269_v29  ;;  %v273_v37 = vmul.f32 %v3885_v0, %v230_v23  ;;  %vm250_vm14 = vcmp.ge.f32.partialorder %v232_v26, 0.0  ;;  %v242_v14 = vld [vmem:[%s3890_s25 + $0x88] sm:$0x1]  ;;  %v3140_v24 = vld [vmem:[%s4442_s3 + $0x10] sm:$0xf] }
  0x1a   : > { %320 = vst.msk [vmem:[#allocation2 + $0x70] sm:$0xff] %vm304_vm1, %v300_v35  ;;  %v289_v39 = vsel %vm246_vm12, %v228_v22, %v271_v32  ;;  %v275_v40 = vmul.f32 %v3885_v0, %v232_v26  ;;  %vm252_vm15 = vcmp.ge.f32.partialorder %v234_v30, 0.0  ;;  %v277_v41 = vmul.f32 %v3885_v0, %v234_v30  ;;  %v3150_v31 = vld [vmem:[%s4442_s3 + $0x14] sm:$0xf] }
  0x1b   : > { %307 = vst.msk [vmem:[#allocation2 + $0x8] sm:$0x1] %vm306_vm2, %v287_v36  ;;  %309 = vst.msk [vmem:[#allocation2 + $0x18] sm:$0x1] %vm306_vm2, %v289_v39  ;;  %v291_v43 = vsel %vm248_vm13, %v230_v23, %v273_v37  ;;  %vm254_vm3 = vcmp.ge.f32.partialorder %v236_v33, 0.0  ;;  %v279_v44 = vmul.f32 %v3885_v0, %v236_v33  ;;  %vm256_vm4 = vcmp.ge.f32.partialorder %v238_v34, 0.0 }
  0x1c   : > { %v3947_v45 = vld [vmem:[#allocation2] sm:$0xff]  ;;  %311 = vst.msk [vmem:[#allocation2 + $0x28] sm:$0x1] %vm306_vm2, %v291_v43  ;;  %v293_v47 = vsel %vm250_vm14, %v232_v26, %v275_v40  ;;  %v295_v48 = vsel %vm252_vm15, %v234_v30, %v277_v41  ;;  %v281_v49 = vmul.f32 %v3885_v0, %v238_v34  ;;  %vm258_vm5 = vcmp.ge.f32.partialorder %v240_v38, 0.0  ;;  %v3962_v53 = vld [vmem:[#allocation2 + $0x10] sm:$0xff] }
  0x1d   : > { %v3949_v46 = vld [vmem:[#allocation2 + $0x20] sm:$0xff]  ;;  %343 = vrot.lane.b32.xlu0 %v3947_v45, %s3837_s30  ;;  %313 = vst.msk [vmem:[#allocation2 + $0x38] sm:$0x1] %vm306_vm2, %v293_v47  ;;  %315 = vst.msk [vmem:[#allocation2 + $0x48] sm:$0x1] %vm306_vm2, %v295_v48  ;;  %v297_v50 = vsel %vm254_vm3, %v236_v33, %v279_v44  ;;  %v283_v51 = vmul.f32 %v3885_v0, %v240_v38  ;;  %vm259_vm6 = vcmp.ge.f32.partialorder %v241_v42, 0.0 }
  0x1e   : > { %347 = vrot.lane.b32.xlu1 %v3949_v46, %s3837_s30  ;;  %v284_v52 = vmul.f32 %v3885_v0, %v241_v42  ;;  %v3964_v54 = vld [vmem:[#allocation2 + $0x30] sm:$0xff]  ;;  %317 = vst.msk [vmem:[#allocation2 + $0x58] sm:$0x1] %vm306_vm2, %v297_v50  ;;  %v299_v55 = vsel %vm256_vm4, %v238_v34, %v281_v49  ;;  %v3975_v58 = vld [vmem:[#allocation2 + $0x40] sm:$0xff]  ;;  %v285_v15 = vmul.f32 %v3885_v0, %v242_v14  ;;  %vm260_vm7 = vcmp.ge.f32.partialorder %v242_v14, 0.0 }
  0x1f   : > { %319 = vst.msk [vmem:[#allocation2 + $0x68] sm:$0x1] %vm306_vm2, %v299_v55  ;;  %v301_v56 = vsel %vm258_vm5, %v240_v38, %v283_v51  ;;  %v3977_v59 = vld [vmem:[#allocation2 + $0x50] sm:$0xff]  ;;  %v3130_v0 = vld [vmem:[%s4442_s3 + $0xc] sm:$0xf] }
  0x20   : > { %v302_v57 = vsel %vm259_vm6, %v241_v42, %v284_v52  ;;  %321 = vst.msk [vmem:[#allocation2 + $0x78] sm:$0x1] %vm306_vm2, %v301_v56  ;;  %v3983_v60 = vld [vmem:[#allocation2 + $0x60] sm:$0xff]  ;;  %v303_v18 = vsel %vm260_vm7, %v242_v14, %v285_v15  ;;  %v3160_v37 = vld [vmem:[%s4442_s3 + $0x18] sm:$0xf] }
  0x21   : > { %322 = vst.msk [vmem:[#allocation2 + $0x80] sm:$0xff] %vm304_vm1, %v302_v57  ;;  %345 = vrot.lane.b32.xlu0 %v3962_v53, %s3837_s30  ;;  %v3985_v61 = vld [vmem:[#allocation2 + $0x70] sm:$0xff]  ;;  %vm359_vm1 = vcmask 31744   ;;  %v3170_v43 = vld [vmem:[%s4442_s3 + $0x1c] sm:$0xf] }
  0x22   : > { %349 = vrot.lane.b32.xlu1 %v3964_v54, %s3837_s30  ;;  %v4015_v62 = vld [vmem:[#allocation2 + $0x1] sm:$0xff]  ;;  %v4017_v63 = vld [vmem:[#allocation2 + $0x11] sm:$0xff]  ;;  %323 = vst.msk [vmem:[#allocation2 + $0x88] sm:$0x1] %vm306_vm2, %v303_v18  ;;  %vm1693_vm2 = vcmask 58368  }
  0x23   : > { %v4023_v1 = vld [vmem:[#allocation2 + $0x21] sm:$0xff] }
  0x24   : > { %v4025_v3 = vld [vmem:[#allocation2 + $0x31] sm:$0xff]  ;;  %v4031_v4 = vld [vmem:[#allocation2 + $0x41] sm:$0xff] }
  0x25   : > { %351 = vrot.lane.b32.xlu0 %v3975_v58, %s3837_s30  ;;  %v4033_v5 = vld [vmem:[#allocation2 + $0x51] sm:$0xff]  ;;  %v3180_v49 = vld [vmem:[%s4442_s3 + $0x20] sm:$0xf] }
  0x26   : > { %353 = vrot.lane.b32.xlu1 %v3977_v59, %s3837_s30  ;;  %v4039_v6 = vld [vmem:[#allocation2 + $0x61] sm:$0xff] }
  0x27   : > { %v4041_v7 = vld [vmem:[#allocation2 + $0x71] sm:$0xff] }
  0x28   : > { %v4059_v8 = vld [vmem:[#allocation2 + $0x80] sm:$0xff] }
  0x29   : > { %355 = vrot.lane.b32.xlu0 %v3983_v60, %s3837_s30  ;;  %v1517_v57 = vld [vmem:[#allocation2 + $0x81] sm:$0xff] }
  0x2a   : > { %357 = vrot.lane.b32.xlu1 %v3985_v61, %s3837_s30 }
  0x2d   : > { %761 = vrot.lane.b32.xlu0 %v3947_v45, %s3838_s6 }
  0x2e   : > { %763 = vrot.lane.b32.xlu1 %v3962_v53, %s3838_s6 }
  0x31   : > { %765 = vrot.lane.b32.xlu0 %v3949_v46, %s3838_s6 }
  0x32   : > { %767 = vrot.lane.b32.xlu1 %v3964_v54, %s3838_s6 }
  0x35   : > { %769 = vrot.lane.b32.xlu0 %v3975_v58, %s3838_s6 }
  0x36   : > { %771 = vrot.lane.b32.xlu1 %v3977_v59, %s3838_s6 }
  0x39   : > { %773 = vrot.lane.b32.xlu0 %v3983_v60, %s3838_s6 }
  0x3a   : > { %775 = vrot.lane.b32.xlu1 %v3985_v61, %s3838_s6 }
  0x3d   : > { %911 = vrot.lane.b32.xlu0 %v3947_v45, %s3839_s7 }
  0x3e   : > { %913 = vrot.lane.b32.xlu1 %v3962_v53, %s3839_s7 }
  0x41   : > { %915 = vrot.lane.b32.xlu0 %v3949_v46, %s3839_s7 }
  0x42   : > { %917 = vrot.lane.b32.xlu1 %v3964_v54, %s3839_s7 }
  0x45   : > { %919 = vrot.lane.b32.xlu0 %v3975_v58, %s3839_s7 }
  0x46   : > { %921 = vrot.lane.b32.xlu1 %v3977_v59, %s3839_s7 }
  0x49   : > { %923 = vrot.lane.b32.xlu0 %v3983_v60, %s3839_s7 }
  0x4a   : > { %925 = vrot.lane.b32.xlu1 %v3985_v61, %s3839_s7 }
  0x4d   : > { %1061 = vrot.lane.b32.xlu0 %v4015_v62, %s3838_s6 }
  0x4e   : > { %1063 = vrot.lane.b32.xlu1 %v4017_v63, %s3838_s6 }
  0x51   : > { %1065 = vrot.lane.b32.xlu0 %v4023_v1, %s3838_s6 }
  0x52   : > { %1067 = vrot.lane.b32.xlu1 %v4025_v3, %s3838_s6 }
  0x55   : > { %1069 = vrot.lane.b32.xlu0 %v4031_v4, %s3838_s6 }
  0x56   : > { %1071 = vrot.lane.b32.xlu1 %v4033_v5, %s3838_s6 }
  0x59   : > { %1073 = vrot.lane.b32.xlu0 %v4039_v6, %s3838_s6 }
  0x5a   : > { %1075 = vrot.lane.b32.xlu1 %v4041_v7, %s3838_s6 }
  0x5d   : > { %1362 = vrot.lane.b32.xlu0 %v3962_v53, %s3837_s30 }
  0x5e   : > { %1364 = vrot.lane.b32.xlu1 %v3949_v46, %s3837_s30 }
  0x61   : > { %1366 = vrot.lane.b32.xlu0 %v3964_v54, %s3837_s30 }
  0x62   : > { %1368 = vrot.lane.b32.xlu1 %v3975_v58, %s3837_s30 }
  0x65   : > { %1370 = vrot.lane.b32.xlu0 %v3977_v59, %s3837_s30 }
  0x66   : > { %1372 = vrot.lane.b32.xlu1 %v3983_v60, %s3837_s30 }
  0x69   : > { %1374 = vrot.lane.b32.xlu0 %v3985_v61, %s3837_s30 }
  0x6a   : > { %1376 = vrot.lane.b32.xlu1 %v4059_v8, %s3837_s30 }
  0x8f   : > { %v344_v9 = vpop.permute.xlu0 %343 }
  0x90   : > { %v348_v10 = vpop.permute.xlu1 %347  ;;  %3438 = vmatprep.mubr.msk.f32.mxu0 %vm359_vm1, %v344_v9 }
  0x93   : > { %v346_v11 = vpop.permute.xlu0 %345 }
  0x94   : > { %v350_v12 = vpop.permute.xlu1 %349  ;;  %3439 = vmatmul.mubr.msk.f32.vlgmr.msra.gmra.mrb[0].mxu0 %vm359_vm1, %v346_v11 }
  0x95   : > { %3451 = vmatpush3.msk.msra.mxu0 %vm376_vm0, %v3898_v2  ;;  %3441 = vmatprep.mubr.msk.f32.mxu0 %vm359_vm1, %v348_v10 }
  0x96   : > { %3464 = vmatprep.subr.msk.mxu0 %vm376_vm0, %v3120_v13 }
  0x97   : > { %v352_v16 = vpop.permute.xlu0 %351 }
  0x98   : > { %v354_v17 = vpop.permute.xlu1 %353  ;;  %3442 = vmatmul.mubr.msk.f32.gmra.mrb[2].mxu0 %vm359_vm1, %v350_v12 }
  0x99   : > { %3444 = vmatprep.mubr.msk.f32.mxu0 %vm359_vm1, %v352_v16 }
  0x9b   : > { %v356_v19 = vpop.permute.xlu0 %355 }
  0x9c   : > { %3445 = vmatmul.mubr.msk.f32.gmra.mrb[4].mxu0 %vm359_vm1, %v354_v17  ;;  %v358_v2 = vpop.permute.xlu1 %357 }
  0x9d   : > { %3447 = vmatprep.mubr.msk.f32.mxu0 %vm359_vm1, %v356_v19 }
  0x9f   : > { %v762_v20 = vpop.permute.xlu0 %761 }
  0xa0   : > { %3448 = vmatmul.mubr.msk.f32.gmra.mrb[6].mxu0 %vm359_vm1, %v358_v2  ;;  %v764_v21 = vpop.permute.xlu1 %763 }
  0xa1   : > { %3452 = vmatprep.mubr.msk.f32.mxu0 %vm359_vm1, %v3947_v45 }
  0xa3   : > { %v766_v22 = vpop.permute.xlu0 %765 }
  0xa4   : > { %3453 = vmatmul.mubr.msk.f32.vlgmr.msra.gmra.mrb[0].mxu0 %vm359_vm1, %v3962_v53  ;;  %v768_v23 = vpop.permute.xlu1 %767 }
  0xa5   : > { %3465 = vmatpush3.msk.msra.mxu0 %vm376_vm0, %v3120_v13  ;;  %3455 = vmatprep.mubr.msk.f32.mxu0 %vm359_vm1, %v3949_v46 }
  0xa6   : > { %3478 = vmatprep.subr.msk.mxu0 %vm376_vm0, %v3130_v0 }
  0xa7   : > { %v770_v25 = vpop.permute.xlu0 %769 }
  0xa8   : > { %3456 = vmatmul.mubr.msk.f32.gmra.mrb[2].mxu0 %vm359_vm1, %v3964_v54  ;;  %v772_v26 = vpop.permute.xlu1 %771 }
  0xa9   : > { %3458 = vmatprep.mubr.msk.f32.mxu0 %vm359_vm1, %v3975_v58 }
  0xab   : > { %v774_v27 = vpop.permute.xlu0 %773 }
  0xac   : > { %3459 = vmatmul.mubr.msk.f32.gmra.mrb[4].mxu0 %vm359_vm1, %v3977_v59  ;;  %v776_v28 = vpop.permute.xlu1 %775 }
  0xad   : > { %3461 = vmatprep.mubr.msk.f32.mxu0 %vm359_vm1, %v3983_v60 }
  0xaf   : > { %v912_v29 = vpop.permute.xlu0 %911 }
  0xb0   : > { %3462 = vmatmul.mubr.msk.f32.gmra.mrb[6].mxu0 %vm359_vm1, %v3985_v61  ;;  %v914_v30 = vpop.permute.xlu1 %913 }
  0xb1   : > { %3466 = vmatprep.mubr.msk.f32.mxu0 %vm359_vm1, %v4015_v62  ;;  %v3190_v62 = vld [vmem:[%s4441_s2] ss:$0 sm:$0xff] }
  0xb3   : > { %v916_v32 = vpop.permute.xlu0 %915 }
  0xb4   : > { %3467 = vmatmul.mubr.msk.f32.vlgmr.msra.gmra.mrb[0].mxu0 %vm359_vm1, %v4017_v63  ;;  %v918_v33 = vpop.permute.xlu1 %917 }
  0xb5   : > { %3479 = vmatpush3.msk.msra.mxu0 %vm376_vm0, %v3130_v0  ;;  %3469 = vmatprep.mubr.msk.f32.mxu0 %vm359_vm1, %v4023_v1  ;;  %v3208_v0 = vld [vmem:[%s4443_s4 + $0x10] sm:$0xff] }
  0xb6   : > { %3492 = vmatprep.subr.msk.mxu0 %vm376_vm0, %v3140_v24 }
  0xb7   : > { %v920_v34 = vpop.permute.xlu0 %919 }
  0xb8   : > { %3470 = vmatmul.mubr.msk.f32.gmra.mrb[2].mxu0 %vm359_vm1, %v4025_v3  ;;  %v922_v35 = vpop.permute.xlu1 %921 }
  0xb9   : > { %3472 = vmatprep.mubr.msk.f32.mxu0 %vm359_vm1, %v4031_v4 }
  0xbb   : > { %v924_v36 = vpop.permute.xlu0 %923 }
  0xbc   : > { %3473 = vmatmul.mubr.msk.f32.gmra.mrb[4].mxu0 %vm359_vm1, %v4033_v5  ;;  %v926_v38 = vpop.permute.xlu1 %925 }
  0xbd   : > { %3475 = vmatprep.mubr.msk.f32.mxu0 %vm359_vm1, %v4039_v6 }
  0xbf   : > { %v1062_v39 = vpop.permute.xlu0 %1061 }
  0xc0   : > { %3476 = vmatmul.mubr.msk.f32.gmra.mrb[6].mxu0 %vm359_vm1, %v4041_v7  ;;  %v1064_v40 = vpop.permute.xlu1 %1063 }
  0xc1   : > { %3480 = vmatprep.mubr.msk.f32.mxu0 %vm359_vm1, %v762_v20 }
  0xc3   : > { %v1066_v41 = vpop.permute.xlu0 %1065 }
  0xc4   : > { %3481 = vmatmul.mubr.msk.f32.vlgmr.msra.gmra.mrb[0].mxu0 %vm359_vm1, %v764_v21  ;;  %v1068_v42 = vpop.permute.xlu1 %1067 }
  0xc5   : > { %3493 = vmatpush3.msk.msra.mxu0 %vm376_vm0, %v3140_v24  ;;  %3483 = vmatprep.mubr.msk.f32.mxu0 %vm359_vm1, %v766_v22 }
  0xc6   : > { %3506 = vmatprep.subr.msk.mxu0 %vm376_vm0, %v3150_v31 }
  0xc7   : > { %v1070_v44 = vpop.permute.xlu0 %1069 }
  0xc8   : > { %3484 = vmatmul.mubr.msk.f32.gmra.mrb[2].mxu0 %vm359_vm1, %v768_v23  ;;  %v1072_v45 = vpop.permute.xlu1 %1071 }
  0xc9   : > { %3486 = vmatprep.mubr.msk.f32.mxu0 %vm359_vm1, %v770_v25 }
  0xcb   : > { %v1074_v47 = vpop.permute.xlu0 %1073 }
  0xcc   : > { %3487 = vmatmul.mubr.msk.f32.gmra.mrb[4].mxu0 %vm359_vm1, %v772_v26  ;;  %v1076_v48 = vpop.permute.xlu1 %1075 }
  0xcd   : > { %3489 = vmatprep.mubr.msk.f32.mxu0 %vm359_vm1, %v774_v27 }
  0xcf   : > { %v1363_v50 = vpop.permute.xlu0 %1362 }
  0xd0   : > { %3490 = vmatmul.mubr.msk.f32.gmra.mrb[6].mxu0 %vm359_vm1, %v776_v28  ;;  %v1365_v51 = vpop.permute.xlu1 %1364 }
  0xd1   : > { %3494 = vmatprep.mubr.msk.f32.mxu0 %vm359_vm1, %v912_v29 }
  0xd4   : > { %3495 = vmatmul.mubr.msk.f32.vlgmr.msra.gmra.mrb[0].mxu0 %vm359_vm1, %v914_v30  ;;  %v1369_v52 = vpop.permute.xlu1 %1368 }
  0xd5   : > { %3507 = vmatpush3.msk.msra.mxu0 %vm376_vm0, %v3150_v31  ;;  %3497 = vmatprep.mubr.msk.f32.mxu0 %vm359_vm1, %v916_v32 }
  0xd6   : > { %3520 = vmatprep.subr.msk.mxu0 %vm376_vm0, %v3160_v37 }
  0xd8   : > { %3498 = vmatmul.mubr.msk.f32.gmra.mrb[2].mxu0 %vm359_vm1, %v918_v33  ;;  %v3217_v33 = vld [vmem:[%s4443_s4 + $0x18] sm:$0xff] }
  0xd9   : > { %3500 = vmatprep.mubr.msk.f32.mxu0 %vm359_vm1, %v920_v34 }
  0xdc   : > { %3501 = vmatmul.mubr.msk.f32.gmra.mrb[4].mxu0 %vm359_vm1, %v922_v35 }
  0xdd   : > { %3503 = vmatprep.mubr.msk.f32.mxu0 %vm359_vm1, %v924_v36 }
  0xe0   : > { %3504 = vmatmul.mubr.msk.f32.gmra.mrb[6].mxu0 %vm359_vm1, %v926_v38 }
  0xe1   : > { %3508 = vmatprep.mubr.msk.f32.mxu0 %vm359_vm1, %v1062_v39 }
  0xe4   : > { %3509 = vmatmul.mubr.msk.f32.vlgmr.msra.gmra.mrb[0].mxu0 %vm359_vm1, %v1064_v40 }
  0xe5   : > { %3521 = vmatpush3.msk.msra.mxu0 %vm376_vm0, %v3160_v37  ;;  %3511 = vmatprep.mubr.msk.f32.mxu0 %vm359_vm1, %v1066_v41 }
  0xe6   : > { %3534 = vmatprep.subr.msk.mxu0 %vm376_vm0, %v3170_v43 }
  0xe8   : > { %3512 = vmatmul.mubr.msk.f32.gmra.mrb[2].mxu0 %vm359_vm1, %v1068_v42  ;;  %v3226_v42 = vld [vmem:[%s4443_s4 + $0x20] sm:$0xff] }
  0xe9   : > { %3514 = vmatprep.mubr.msk.f32.mxu0 %vm359_vm1, %v1070_v44 }
  0xec   : > { %3515 = vmatmul.mubr.msk.f32.gmra.mrb[4].mxu0 %vm359_vm1, %v1072_v45 }
  0xed   : > { %3517 = vmatprep.mubr.msk.f32.mxu0 %vm359_vm1, %v1074_v47 }
  0xf0   : > { %3518 = vmatmul.mubr.msk.f32.gmra.mrb[6].mxu0 %vm359_vm1, %v1076_v48 }
  0xf1   : > { %3522 = vmatprep.mubr.msk.f32.mxu0 %vm359_vm1, %v3962_v53 }
  0xf4   : > { %3523 = vmatmul.mubr.msk.f32.vlgmr.msra.gmra.mrb[0].mxu0 %vm359_vm1, %v3949_v46  ;;  %v1367_v46 = vpop.permute.xlu0 %1366 }
  0xf5   : > { %3535 = vmatpush3.msk.msra.mxu0 %vm376_vm0, %v3170_v43  ;;  %3525 = vmatprep.mubr.msk.f32.mxu0 %vm359_vm1, %v3964_v54  ;;  %v1373_v54 = vpop.permute.xlu1 %1372 }
  0xf6   : > { %3548 = vmatprep.subr.msk.mxu0 %vm376_vm0, %v3180_v49 }
  0xf8   : > { %3526 = vmatmul.mubr.msk.f32.gmra.mrb[2].mxu0 %vm359_vm1, %v3975_v58  ;;  %v1371_v53 = vpop.permute.xlu0 %1370  ;;  %v3840_v58 = vmov 0.0  }
  0xf9   : > { %3528 = vmatprep.mubr.msk.f32.mxu0 %vm359_vm1, %v3977_v59  ;;  %v1377_v56 = vpop.permute.xlu1 %1376  ;;  %1698 = vst.msk [vmem:[#allocation3 + $0x28] sm:$0x3] %vm1693_vm2, %v3840_v58  ;;  %1694 = vst.msk [vmem:[#allocation3 + $0x8] sm:$0x3] %vm1693_vm2, %v3840_v58  ;;  %v3191_v59 = vld [vmem:[%s4443_s4 + $0x8] sm:$0xff] }
  0xfa   : > { %1696 = vst.msk [vmem:[#allocation3 + $0x18] sm:$0x3] %vm1693_vm2, %v3840_v58  ;;  %1700 = vst.msk [vmem:[#allocation3 + $0x38] sm:$0x3] %vm1693_vm2, %v3840_v58  ;;  %3562 = vmatprep.subr.mxu1 %v3191_v59 }
  0xfb   : > { %1702 = vst.msk [vmem:[#allocation3 + $0x48] sm:$0x3] %vm1693_vm2, %v3840_v58  ;;  %1704 = vst.msk [vmem:[#allocation3 + $0x58] sm:$0x3] %vm1693_vm2, %v3840_v58  ;;  %3563 = vmatpush3.msra.mxu1 %v3191_v59 }
  0xfc   : > { %3529 = vmatmul.mubr.msk.f32.gmra.mrb[4].mxu0 %vm359_vm1, %v3983_v60  ;;  %v1375_v55 = vpop.permute.xlu0 %1374  ;;  %1706 = vst.msk [vmem:[#allocation3 + $0x68] sm:$0x3] %vm1693_vm2, %v3840_v58  ;;  %1708 = vst.msk [vmem:[#allocation3 + $0x78] sm:$0x3] %vm1693_vm2, %v3840_v58 }
  0xfd   : > { %3531 = vmatprep.mubr.msk.f32.mxu0 %vm359_vm1, %v3985_v61  ;;  %1710 = vst.msk [vmem:[#allocation3 + $0x88] sm:$0x3] %vm1693_vm2, %v3840_v58  ;;  %1712 = vst.msk [vmem:[#allocation3 + $0x98] sm:$0x3] %vm1693_vm2, %v3840_v58  ;;  %v1730_v61 = vld [vmem:[%s4443_s4] sm:$0xff] }
  0xfe   : > { %3576 = vmatprep.subr.mxu1 %v1730_v61 }
 0x100   : > { %3532 = vmatmul.mubr.msk.f32.gmra.mrb[6].mxu0 %vm359_vm1, %v4059_v8 }
 0x101   : > { %3536 = vmatprep.mubr.msk.f32.mxu0 %vm359_vm1, %v1363_v50  ;;  %v3235_v50 = vld [vmem:[%s4443_s4 + $0x28] sm:$0xff] }
 0x104   : > { %3537 = vmatmul.mubr.msk.f32.vlgmr.msra.gmra.mrb[0].mxu0 %vm359_vm1, %v1365_v51 }
 0x105   : > { %3549 = vmatpush3.msk.msra.mxu0 %vm376_vm0, %v3180_v49  ;;  %3539 = vmatprep.mubr.msk.f32.mxu0 %vm359_vm1, %v1367_v46  ;;  %vm1691_vm0 = vcmask 64512   ;;  %v3244_v46 = vld [vmem:[%s4443_s4 + $0x30] sm:$0xff] }
 0x106   : > { %1697 = vst.msk [vmem:[#allocation3 + $0x20] sm:$0xff] %vm1691_vm0, %v3840_v58  ;;  %1692 = vst.msk [vmem:[#allocation3] sm:$0xff] %vm1691_vm0, %v3840_v58 }
 0x107   : > { %1695 = vst.msk [vmem:[#allocation3 + $0x10] sm:$0xff] %vm1691_vm0, %v3840_v58  ;;  %1699 = vst.msk [vmem:[#allocation3 + $0x30] sm:$0xff] %vm1691_vm0, %v3840_v58 }
 0x108   : > { %3540 = vmatmul.mubr.msk.f32.gmra.mrb[2].mxu0 %vm359_vm1, %v1369_v52  ;;  %1701 = vst.msk [vmem:[#allocation3 + $0x40] sm:$0xff] %vm1691_vm0, %v3840_v58  ;;  %1703 = vst.msk [vmem:[#allocation3 + $0x50] sm:$0xff] %vm1691_vm0, %v3840_v58 }
 0x109   : > { %3542 = vmatprep.mubr.msk.f32.mxu0 %vm359_vm1, %v1371_v53  ;;  %1705 = vst.msk [vmem:[#allocation3 + $0x60] sm:$0xff] %vm1691_vm0, %v3840_v58  ;;  %1707 = vst.msk [vmem:[#allocation3 + $0x70] sm:$0xff] %vm1691_vm0, %v3840_v58  ;;  %v3253_v53 = vld [vmem:[%s4443_s4 + $0x38] sm:$0xff] }
 0x10a   : > { %1709 = vst.msk [vmem:[#allocation3 + $0x80] sm:$0xff] %vm1691_vm0, %v3840_v58  ;;  %1711 = vst.msk [vmem:[#allocation3 + $0x90] sm:$0xff] %vm1691_vm0, %v3840_v58 }
 0x10c   : > { %3543 = vmatmul.mubr.msk.f32.gmra.mrb[4].mxu0 %vm359_vm1, %v1373_v54 }
 0x10d   : > { %3545 = vmatprep.mubr.msk.f32.mxu0 %vm359_vm1, %v1375_v55  ;;  %v1731_v60 = vld [vmem:[#allocation3 + $0x1] sm:$0xff]  ;;  %v3262_v55 = vld [vmem:[%s4443_s4 + $0x40] sm:$0xff] }
 0x10e   : > { %3564 = vmatprep.mubr.msk.f32.mxu1 %vm1691_vm0, %v1731_v60  ;;  %v1722_v30 = vld [vmem:[#allocation3] sm:$0xff] }
 0x10f   : > { %v1999_v39 = vld [vmem:[#allocation3 + $0x2] sm:$0xff] }
 0x110   : > { %3546 = vmatmul.mubr.msk.f32.gmra.mrb[6].mxu0 %vm359_vm1, %v1377_v56 }
 0x111   : > { %3550 = vmatprep.mubr.msk.f32.mxu0 %vm359_vm1, %v4017_v63  ;;  %v2595_v56 = vld [vmem:[#allocation3 + $0x90] sm:$0xff] }
 0x112   : > { %v2889_v58 = vld [vmem:[#allocation3 + $0x92] sm:$0xff] }
 0x114   : > { %3551 = vmatmul.mubr.msk.f32.vlgmr.msra.gmra.mrb[0].mxu0 %vm359_vm1, %v4023_v1 }
 0x115   : > { %3553 = vmatprep.mubr.msk.f32.mxu0 %vm359_vm1, %v4025_v3 }
 0x118   : > { %3554 = vmatmul.mubr.msk.f32.gmra.mrb[2].mxu0 %vm359_vm1, %v4031_v4 }
 0x119   : > { %3556 = vmatprep.mubr.msk.f32.mxu0 %vm359_vm1, %v4033_v5 }
 0x11c   : > { %3557 = vmatmul.mubr.msk.f32.gmra.mrb[4].mxu0 %vm359_vm1, %v4039_v6 }
 0x11d   : > { %3559 = vmatprep.mubr.msk.f32.mxu0 %vm359_vm1, %v4041_v7 }
 0x120   : > { %3560 = vmatmul.mubr.msk.f32.gmra.mrb[6].mxu0 %vm359_vm1, %v1517_v57  ;;  %v2742_v57 = vld [vmem:[#allocation3 + $0x91] sm:$0xff] }
 0x1e7   : > { %v3552_v63 = vpop.f32.mrb[0].mxu0 }
 0x1e8   : > { %vm1661_vm8 = vcmp.ge.f32.partialorder %v3552_v63, 0.0  ;;  %v1676_v1 = vmul.f32 %v3552_v63, %v3190_v62  ;;  %v1613_v3 = vpop.f32.mrb[1].mxu0 }
 0x1e9   : > { %vm1660_vm9 = vcmp.ge.f32.partialorder %v1613_v3, 0.0  ;;  %v1675_v4 = vmul.f32 %v3190_v62, %v1613_v3 }
 0x1ea   : > { %v1684_v5 = vsel %vm1661_vm8, %v3552_v63, %v1676_v1 }
 0x1eb   : > { %1715 = vst.msk [vmem:[#allocation3 + $0x21] sm:$0xff] %vm1691_vm0, %v1684_v5  ;;  %v1683_v6 = vsel %vm1660_vm9, %v1613_v3, %v1675_v4  ;;  %v3555_v7 = vpop.f32.mrb[2].mxu0 }
 0x1ec   : > { %1714 = vst.msk [vmem:[#allocation3 + $0x11] sm:$0xff] %vm1691_vm0, %v1683_v6  ;;  %vm1663_vm10 = vcmp.ge.f32.partialorder %v3555_v7, 0.0  ;;  %v1678_v8 = vmul.f32 %v3555_v7, %v3190_v62  ;;  %v1623_v9 = vpop.f32.mrb[3].mxu0 }
 0x1ed   : > { %vm1662_vm11 = vcmp.ge.f32.partialorder %v1623_v9, 0.0  ;;  %v1677_v10 = vmul.f32 %v3190_v62, %v1623_v9 }
 0x1ee   : > { %v1686_v11 = vsel %vm1663_vm10, %v3555_v7, %v1678_v8 }
 0x1ef   : > { %1717 = vst.msk [vmem:[#allocation3 + $0x41] sm:$0xff] %vm1691_vm0, %v1686_v11  ;;  %v1685_v12 = vsel %vm1662_vm11, %v1623_v9, %v1677_v10  ;;  %v3558_v13 = vpop.f32.mrb[4].mxu0 }
 0x1f0   : > { %1716 = vst.msk [vmem:[#allocation3 + $0x31] sm:$0xff] %vm1691_vm0, %v1685_v12  ;;  %vm1665_vm12 = vcmp.ge.f32.partialorder %v3558_v13, 0.0  ;;  %v1680_v14 = vmul.f32 %v3558_v13, %v3190_v62  ;;  %v1633_v15 = vpop.f32.mrb[5].mxu0 }
 0x1f1   : > { %vm1664_vm13 = vcmp.ge.f32.partialorder %v1633_v15, 0.0  ;;  %v1679_v16 = vmul.f32 %v3190_v62, %v1633_v15 }
 0x1f2   : > { %v1688_v17 = vsel %vm1665_vm12, %v3558_v13, %v1680_v14  ;;  %v4251_v22 = vld [vmem:[#allocation3 + $0x21] sm:$0xff] }
 0x1f3   : > { %1719 = vst.msk [vmem:[#allocation3 + $0x61] sm:$0xff] %vm1691_vm0, %v1688_v17  ;;  %v1687_v18 = vsel %vm1664_vm13, %v1633_v15, %v1679_v16  ;;  %v3561_v19 = vpop.f32.mrb[6].mxu0  ;;  %v4243_v2 = vld [vmem:[#allocation3 + $0x11] sm:$0xff]  ;;  %v4282_v34 = vld [vmem:[#allocation3 + $0x20] sm:$0xff] }
 0x1f4   : > { %1718 = vst.msk [vmem:[#allocation3 + $0x51] sm:$0xff] %vm1691_vm0, %v1687_v18  ;;  %vm1667_vm14 = vcmp.ge.f32.partialorder %v3561_v19, 0.0  ;;  %v1682_v20 = vmul.f32 %v3561_v19, %v3190_v62  ;;  %v1643_v21 = vpop.f32.mrb[7].mxu0  ;;  %3565 = vmatmul.mubr.msk.f32.vlgmr.msra.gmra.mrb[0].mxu1 %vm1691_vm0, %v4243_v2  ;;  %v1723_v32 = vld [vmem:[#allocation3 + $0x10] sm:$0xff]  ;;  %v4311_v43 = vld [vmem:[#allocation3 + $0x22] sm:$0xff] }
 0x1f5   : > { %vm1666_vm15 = vcmp.ge.f32.partialorder %v1643_v21, 0.0  ;;  %v1681_v23 = vmul.f32 %v3190_v62, %v1643_v21  ;;  %3577 = vmatpush3.msra.mxu1 %v1730_v61  ;;  %3567 = vmatprep.mubr.msk.f32.mxu1 %vm1691_vm0, %v4251_v22  ;;  %v2000_v41 = vld [vmem:[#allocation3 + $0x12] sm:$0xff] }
 0x1f6   : > { %v1690_v24 = vsel %vm1667_vm14, %v3561_v19, %v1682_v20  ;;  %3590 = vmatprep.subr.mxu1 %v3208_v0  ;;  %v4261_v27 = vld [vmem:[#allocation3 + $0x41] sm:$0xff] }
 0x1f7   : > { %1721 = vst.msk [vmem:[#allocation3 + $0x81] sm:$0xff] %vm1691_vm0, %v1690_v24  ;;  %v1689_v25 = vsel %vm1666_vm15, %v1643_v21, %v1681_v23  ;;  %v4256_v26 = vld [vmem:[#allocation3 + $0x31] sm:$0xff]  ;;  %v4290_v36 = vld [vmem:[#allocation3 + $0x40] sm:$0xff] }
 0x1f8   : > { %1720 = vst.msk [vmem:[#allocation3 + $0x71] sm:$0xff] %vm1691_vm0, %v1689_v25  ;;  %3568 = vmatmul.mubr.msk.f32.gmra.mrb[2].mxu1 %vm1691_vm0, %v4256_v26  ;;  %v4286_v35 = vld [vmem:[#allocation3 + $0x30] sm:$0xff]  ;;  %v4319_v45 = vld [vmem:[#allocation3 + $0x42] sm:$0xff] }
 0x1f9   : > { %3570 = vmatprep.mubr.msk.f32.mxu1 %vm1691_vm0, %v4261_v27  ;;  %v4315_v44 = vld [vmem:[#allocation3 + $0x32] sm:$0xff] }
 0x1fa   : > { %v4269_v29 = vld [vmem:[#allocation3 + $0x61] sm:$0xff] }
 0x1fb   : > { %v4265_v28 = vld [vmem:[#allocation3 + $0x51] sm:$0xff]  ;;  %v4298_v38 = vld [vmem:[#allocation3 + $0x60] sm:$0xff] }
 0x1fc   : > { %3571 = vmatmul.mubr.msk.f32.gmra.mrb[4].mxu1 %vm1691_vm0, %v4265_v28  ;;  %v4294_v37 = vld [vmem:[#allocation3 + $0x50] sm:$0xff]  ;;  %v4327_v48 = vld [vmem:[#allocation3 + $0x62] sm:$0xff] }
 0x1fd   : > { %3573 = vmatprep.mubr.msk.f32.mxu1 %vm1691_vm0, %v4269_v29  ;;  %v4323_v47 = vld [vmem:[#allocation3 + $0x52] sm:$0xff] }
 0x1fe   : > { %v2153_v51 = vld [vmem:[#allocation3 + $0x80] sm:$0xff] }
 0x1ff   : > { %v4273_v31 = vld [vmem:[#allocation3 + $0x71] sm:$0xff]  ;;  %v2300_v52 = vld [vmem:[#allocation3 + $0x81] sm:$0xff] }
 0x200   : > { %3574 = vmatmul.mubr.msk.f32.gmra.mrb[6].mxu1 %vm1691_vm0, %v4273_v31  ;;  %v4302_v40 = vld [vmem:[#allocation3 + $0x70] sm:$0xff]  ;;  %v2447_v54 = vld [vmem:[#allocation3 + $0x82] sm:$0xff] }
 0x201   : > { %3578 = vmatprep.mubr.msk.f32.mxu1 %vm1691_vm0, %v1722_v30  ;;  %v4331_v49 = vld [vmem:[#allocation3 + $0x72] sm:$0xff] }
 0x204   : > { %3579 = vmatmul.mubr.msk.f32.vlgmr.msra.gmra.mrb[0].mxu1 %vm1691_vm0, %v1723_v32 }
 0x205   : > { %3591 = vmatpush3.msra.mxu1 %v3208_v0  ;;  %3581 = vmatprep.mubr.msk.f32.mxu1 %vm1691_vm0, %v4282_v34 }
 0x206   : > { %3604 = vmatprep.subr.mxu1 %v3217_v33 }
 0x208   : > { %3582 = vmatmul.mubr.msk.f32.gmra.mrb[2].mxu1 %vm1691_vm0, %v4286_v35 }
 0x209   : > { %3584 = vmatprep.mubr.msk.f32.mxu1 %vm1691_vm0, %v4290_v36 }
 0x20c   : > { %3585 = vmatmul.mubr.msk.f32.gmra.mrb[4].mxu1 %vm1691_vm0, %v4294_v37 }
 0x20d   : > { %3587 = vmatprep.mubr.msk.f32.mxu1 %vm1691_vm0, %v4298_v38 }
 0x210   : > { %3588 = vmatmul.mubr.msk.f32.gmra.mrb[6].mxu1 %vm1691_vm0, %v4302_v40 }
 0x211   : > { %3592 = vmatprep.mubr.msk.f32.mxu1 %vm1691_vm0, %v1999_v39 }
 0x214   : > { %3593 = vmatmul.mubr.msk.f32.vlgmr.msra.gmra.mrb[0].mxu1 %vm1691_vm0, %v2000_v41 }
 0x215   : > { %3605 = vmatpush3.msra.mxu1 %v3217_v33  ;;  %3595 = vmatprep.mubr.msk.f32.mxu1 %vm1691_vm0, %v4311_v43 }
 0x216   : > { %3618 = vmatprep.subr.mxu1 %v3226_v42 }
 0x218   : > { %3596 = vmatmul.mubr.msk.f32.gmra.mrb[2].mxu1 %vm1691_vm0, %v4315_v44 }
 0x219   : > { %3598 = vmatprep.mubr.msk.f32.mxu1 %vm1691_vm0, %v4319_v45 }
 0x21c   : > { %3599 = vmatmul.mubr.msk.f32.gmra.mrb[4].mxu1 %vm1691_vm0, %v4323_v47 }
 0x21d   : > { %3601 = vmatprep.mubr.msk.f32.mxu1 %vm1691_vm0, %v4327_v48 }
 0x220   : > { %3602 = vmatmul.mubr.msk.f32.gmra.mrb[6].mxu1 %vm1691_vm0, %v4331_v49 }
 0x221   : > { %3606 = vmatprep.mubr.msk.f32.mxu1 %vm1691_vm0, %v1723_v32 }
 0x224   : > { %3607 = vmatmul.mubr.msk.f32.vlgmr.msra.gmra.mrb[0].mxu1 %vm1691_vm0, %v4282_v34 }
 0x225   : > { %3619 = vmatpush3.msra.mxu1 %v3226_v42  ;;  %3609 = vmatprep.mubr.msk.f32.mxu1 %vm1691_vm0, %v4286_v35 }
 0x226   : > { %3632 = vmatprep.subr.mxu1 %v3235_v50 }
 0x228   : > { %3610 = vmatmul.mubr.msk.f32.gmra.mrb[2].mxu1 %vm1691_vm0, %v4290_v36 }
 0x229   : > { %3612 = vmatprep.mubr.msk.f32.mxu1 %vm1691_vm0, %v4294_v37 }
 0x22c   : > { %3613 = vmatmul.mubr.msk.f32.gmra.mrb[4].mxu1 %vm1691_vm0, %v4298_v38 }
 0x22d   : > { %3615 = vmatprep.mubr.msk.f32.mxu1 %vm1691_vm0, %v4302_v40 }
 0x230   : > { %3616 = vmatmul.mubr.msk.f32.gmra.mrb[6].mxu1 %vm1691_vm0, %v2153_v51 }
 0x231   : > { %3620 = vmatprep.mubr.msk.f32.mxu1 %vm1691_vm0, %v4243_v2 }
 0x234   : > { %3621 = vmatmul.mubr.msk.f32.vlgmr.msra.gmra.mrb[0].mxu1 %vm1691_vm0, %v4251_v22 }
 0x235   : > { %3633 = vmatpush3.msra.mxu1 %v3235_v50  ;;  %3623 = vmatprep.mubr.msk.f32.mxu1 %vm1691_vm0, %v4256_v26 }
 0x236   : > { %3646 = vmatprep.subr.mxu1 %v3244_v46 }
 0x238   : > { %3624 = vmatmul.mubr.msk.f32.gmra.mrb[2].mxu1 %vm1691_vm0, %v4261_v27 }
 0x239   : > { %3626 = vmatprep.mubr.msk.f32.mxu1 %vm1691_vm0, %v4265_v28 }
 0x23c   : > { %3627 = vmatmul.mubr.msk.f32.gmra.mrb[4].mxu1 %vm1691_vm0, %v4269_v29 }
 0x23d   : > { %3629 = vmatprep.mubr.msk.f32.mxu1 %vm1691_vm0, %v4273_v31 }
 0x240   : > { %3630 = vmatmul.mubr.msk.f32.gmra.mrb[6].mxu1 %vm1691_vm0, %v2300_v52 }
 0x241   : > { %3634 = vmatprep.mubr.msk.f32.mxu1 %vm1691_vm0, %v2000_v41 }
 0x244   : > { %3635 = vmatmul.mubr.msk.f32.vlgmr.msra.gmra.mrb[0].mxu1 %vm1691_vm0, %v4311_v43 }
 0x245   : > { %3647 = vmatpush3.msra.mxu1 %v3244_v46  ;;  %3637 = vmatprep.mubr.msk.f32.mxu1 %vm1691_vm0, %v4315_v44 }
 0x246   : > { %3660 = vmatprep.subr.mxu1 %v3253_v53 }
 0x248   : > { %3638 = vmatmul.mubr.msk.f32.gmra.mrb[2].mxu1 %vm1691_vm0, %v4319_v45 }
 0x249   : > { %3640 = vmatprep.mubr.msk.f32.mxu1 %vm1691_vm0, %v4323_v47 }
 0x24c   : > { %3641 = vmatmul.mubr.msk.f32.gmra.mrb[4].mxu1 %vm1691_vm0, %v4327_v48 }
 0x24d   : > { %3643 = vmatprep.mubr.msk.f32.mxu1 %vm1691_vm0, %v4331_v49 }
 0x250   : > { %3644 = vmatmul.mubr.msk.f32.gmra.mrb[6].mxu1 %vm1691_vm0, %v2447_v54 }
 0x251   : > { %3648 = vmatprep.mubr.msk.f32.mxu1 %vm1691_vm0, %v4282_v34 }
 0x254   : > { %3649 = vmatmul.mubr.msk.f32.vlgmr.msra.gmra.mrb[0].mxu1 %vm1691_vm0, %v4286_v35 }
 0x255   : > { %3661 = vmatpush3.msra.mxu1 %v3253_v53  ;;  %3651 = vmatprep.mubr.msk.f32.mxu1 %vm1691_vm0, %v4290_v36 }
 0x256   : > { %3674 = vmatprep.subr.mxu1 %v3262_v55 }
 0x258   : > { %3652 = vmatmul.mubr.msk.f32.gmra.mrb[2].mxu1 %vm1691_vm0, %v4294_v37 }
 0x259   : > { %3654 = vmatprep.mubr.msk.f32.mxu1 %vm1691_vm0, %v4298_v38 }
 0x25c   : > { %3655 = vmatmul.mubr.msk.f32.gmra.mrb[4].mxu1 %vm1691_vm0, %v4302_v40 }
 0x25d   : > { %3657 = vmatprep.mubr.msk.f32.mxu1 %vm1691_vm0, %v2153_v51 }
 0x260   : > { %3658 = vmatmul.mubr.msk.f32.gmra.mrb[6].mxu1 %vm1691_vm0, %v2595_v56 }
 0x261   : > { %3662 = vmatprep.mubr.msk.f32.mxu1 %vm1691_vm0, %v4251_v22 }
 0x264   : > { %3663 = vmatmul.mubr.msk.f32.vlgmr.msra.gmra.mrb[0].mxu1 %vm1691_vm0, %v4256_v26 }
 0x265   : > { %3675 = vmatpush3.msra.mxu1 %v3262_v55  ;;  %3665 = vmatprep.mubr.msk.f32.mxu1 %vm1691_vm0, %v4261_v27 }
 0x268   : > { %3666 = vmatmul.mubr.msk.f32.gmra.mrb[2].mxu1 %vm1691_vm0, %v4265_v28 }
 0x269   : > { %3668 = vmatprep.mubr.msk.f32.mxu1 %vm1691_vm0, %v4269_v29 }
 0x26c   : > { %3669 = vmatmul.mubr.msk.f32.gmra.mrb[4].mxu1 %vm1691_vm0, %v4273_v31 }
 0x26d   : > { %3671 = vmatprep.mubr.msk.f32.mxu1 %vm1691_vm0, %v2300_v52 }
 0x270   : > { %3672 = vmatmul.mubr.msk.f32.gmra.mrb[6].mxu1 %vm1691_vm0, %v2742_v57 }
 0x271   : > { %3676 = vmatprep.mubr.msk.f32.mxu1 %vm1691_vm0, %v4311_v43 }
 0x274   : > { %3677 = vmatmul.mubr.msk.f32.vlgmr.msra.gmra.mrb[0].mxu1 %vm1691_vm0, %v4315_v44 }
 0x275   : > { %3679 = vmatprep.mubr.msk.f32.mxu1 %vm1691_vm0, %v4319_v45 }
 0x278   : > { %3680 = vmatmul.mubr.msk.f32.gmra.mrb[2].mxu1 %vm1691_vm0, %v4323_v47 }
 0x279   : > { %3682 = vmatprep.mubr.msk.f32.mxu1 %vm1691_vm0, %v4327_v48 }
 0x27c   : > { %3683 = vmatmul.mubr.msk.f32.gmra.mrb[4].mxu1 %vm1691_vm0, %v4331_v49 }
 0x27d   : > { %3685 = vmatprep.mubr.msk.f32.mxu1 %vm1691_vm0, %v2447_v54 }
 0x280   : > { %3686 = vmatmul.mubr.msk.f32.gmra.mrb[6].mxu1 %vm1691_vm0, %v2889_v58 }
 0x347   : > { %v3678_v59 = vpop.f32.mrb[0].mxu1 }
 0x348   : > { %3030 = vst [vmem:[%s224_s24 + $0x8] sm:$0xff] %v3678_v59  ;;  %v2982_v60 = vpop.f32.mrb[1].mxu1 }
 0x349   : > { %3029 = vst [vmem:[%s224_s24] sm:$0xff] %v2982_v60 }
 0x34b   : > { %v3681_v61 = vpop.f32.mrb[2].mxu1 }
 0x34c   : > { %3032 = vst [vmem:[%s224_s24 + $0x18] sm:$0xff] %v3681_v61  ;;  %v2992_v62 = vpop.f32.mrb[3].mxu1 }
 0x34d   : > { %3031 = vst [vmem:[%s224_s24 + $0x10] sm:$0xff] %v2992_v62 }
 0x34f   : > { %v3684_v63 = vpop.f32.mrb[4].mxu1 }
 0x350   : > { %3034 = vst [vmem:[%s224_s24 + $0x28] sm:$0xff] %v3684_v63  ;;  %v3002_v1 = vpop.f32.mrb[5].mxu1 }
 0x351   : > { %3033 = vst [vmem:[%s224_s24 + $0x20] sm:$0xff] %v3002_v1 }
 0x353   : > { %v3687_v3 = vpop.f32.mrb[6].mxu1 }
 0x354   : > { %3036 = vst [vmem:[%s224_s24 + $0x38] sm:$0xff] %v3687_v3  ;;  %v3012_v4 = vpop.f32.mrb[7].mxu1 }
 0x355   : > { %3035 = vst [vmem:[%s224_s24 + $0x30] sm:$0xff] %v3012_v4 }
 0x356 PF: > { %s15_s18 = sadd.s32 1, %s3835_s18  }
 0x357   : > { %p12_p4 = scmp.ge.s32.totalorder %s15_s18, 4  }
 0x359   :  { %14 = sbr.rel (!%p12_p4) target bundleno = 1 (0x1), region = 89 }

</bundles_post_ra>
